<compile_context>
chip_gen: v7x
topology: tpu7x:2x2x1
jax: 0.10.0
libtpu: 0.0.40
codegen_flags: <defaults>
</compile_context>

<pallas_src>
import functools

import jax
import jax.numpy as jnp
from jax import lax
from jax.experimental import pallas as pl
from jax.experimental.pallas import tpu as pltpu


def _round_up(x, m):
    return ((x + m - 1) // m) * m


def _dice_sums_kernel(score_ref, target_ref,
                      inter_ref, zsum_ref, ysum_ref,
                      inter_acc, zsum_acc, ysum_acc,
                      *, apply_softmax):
    # score_ref : (C, T)  input dtype -- one flat-pixel tile, all C classes
    # target_ref: (1, T)  int32       -- labels for the same tile (-1 = padding)
    # *_ref     : (C, 1)  f32 outputs -- per-(batch, class) sums
    # *_acc     : (C, 1)  f32 scratch -- accumulators across the tile axis
    t = pl.program_id(1)

    @pl.when(t == 0)
    def _init():
        inter_acc[...] = jnp.zeros_like(inter_acc)
        zsum_acc[...] = jnp.zeros_like(zsum_acc)
        ysum_acc[...] = jnp.zeros_like(ysum_acc)

    s = score_ref[...].astype(jnp.float32)            # (C, T) f32
    tgt = target_ref[...]                             # (1, T) int32

    if apply_softmax:
        m = jnp.max(s, axis=0, keepdims=True)         # (1, T) cross-sublane (XLU)
        e = jnp.exp(s - m)                            # EUP
        s = e / jnp.sum(e, axis=0, keepdims=True)

    # Zero padded pixels (label == -1) so they contribute nothing to z_sum
    # (intersect / y_sum are already protected because -1 matches no class).
    valid = tgt >= 0                                  # (1, T)
    s = jnp.where(valid, s, 0.0)                      # (C, T)

    class_ids = lax.broadcasted_iota(jnp.int32, s.shape, 0)
    onehot = (tgt == class_ids).astype(jnp.float32)   # (C, T)

    inter_acc[...] += jnp.sum(s * onehot, axis=1, keepdims=True)
    zsum_acc[...] += jnp.sum(s * s, axis=1, keepdims=True)
    ysum_acc[...] += jnp.sum(onehot, axis=1, keepdims=True)  # onehot^2 == onehot

    @pl.when(t == pl.num_programs(1) - 1)
    def _finalize():
        inter_ref[...] = inter_acc[...]
        zsum_ref[...] = zsum_acc[...]
        ysum_ref[...] = ysum_acc[...]


def dice_loss(inputs, target, weight=None, softmax=False, *, tile_lanes=8192):
    """Pallas equivalent of Dice_loss.forward(inputs, target, weight, softmax).

    inputs: (N, C, H, W) scores (any float dtype; upcast in-kernel)
    target: (N, H, W) integer class labels
    """
    N, C, H, W = inputs.shape
    L = H * W

    # Free reshapes only -- no transpose, no dtype cast, no wrapper softmax.
    score = inputs.reshape(N, C, L)
    tgt = target.astype(jnp.int32).reshape(N, 1, L)

    # Tile the flat pixel axis; tile must be a multiple of 128 lanes.
    T = min(_round_up(tile_lanes, 128), _round_up(L, 128))
    n_tiles = (L + T - 1) // T
    Lp = n_tiles * T
    if Lp != L:
        score = jnp.pad(score, ((0, 0), (0, 0), (0, Lp - L)))
        tgt = jnp.pad(tgt, ((0, 0), (0, 0), (0, Lp - L)), constant_values=-1)

    out_sd = jax.ShapeDtypeStruct((N, C, 1), jnp.float32)
    kernel = functools.partial(_dice_sums_kernel, apply_softmax=bool(softmax))

    inter, zsum, ysum = pl.pallas_call(
        kernel,
        out_shape=(out_sd, out_sd, out_sd),
        grid_spec=pltpu.PrefetchScalarGridSpec(
            num_scalar_prefetch=0,
            grid=(N, n_tiles),
            in_specs=[
                # score tile: all classes x T flat pixels of batch b
                pl.BlockSpec((None, C, T), lambda b, t: (b, 0, t)),
                # label tile: read exactly once per (b, t)
                pl.BlockSpec((None, 1, T), lambda b, t: (b, 0, t)),
            ],
            out_specs=(
                pl.BlockSpec((None, C, 1), lambda b, t: (b, 0, 0)),
                pl.BlockSpec((None, C, 1), lambda b, t: (b, 0, 0)),
                pl.BlockSpec((None, C, 1), lambda b, t: (b, 0, 0)),
            ),
            scratch_shapes=[
                pltpu.VMEM((C, 1), jnp.float32),
                pltpu.VMEM((C, 1), jnp.float32),
                pltpu.VMEM((C, 1), jnp.float32),
            ],
        ),
        compiler_params=pltpu.CompilerParams(
            dimension_semantics=("parallel", "arbitrary"),
            vmem_limit_bytes=32 * 1024 * 1024,
        ),
    )(score, tgt)

    # Tiny epilogue: reduce per-batch partials and form the weighted loss.
    intersect = jnp.sum(inter[:, :, 0], axis=0)   # (C,)
    z_sum = jnp.sum(zsum[:, :, 0], axis=0)
    y_sum = jnp.sum(ysum[:, :, 0], axis=0)

    smooth = 1e-05
    dice = 1.0 - (2.0 * intersect + smooth) / (z_sum + y_sum + smooth)

    if weight is None:
        weight = jnp.ones((C,), jnp.float32)      # [1] * n_classes
    else:
        weight = jnp.asarray(weight, jnp.float32)

    return jnp.sum(dice * weight) / C


def _dice_loss_ref(inputs, target, weight=None, softmax=False):
    """Pure-JAX reference mirroring the PyTorch module."""
    inputs = inputs.astype(jnp.float32)
    if softmax:
        inputs = jax.nn.softmax(inputs, axis=1)
    C = inputs.shape[1]
    onehot = jax.nn.one_hot(target.astype(jnp.int32), C, axis=1, dtype=jnp.float32)
    smooth = 1e-05
    if weight is None:
        weight = jnp.ones((C,), jnp.float32)
    weight = jnp.asarray(weight, jnp.float32)
    loss = 0.0
    for i in range(C):
        s = inputs[:, i]
        t = onehot[:, i]
        intersect = jnp.sum(s * t)
        y = jnp.sum(t * t)
        z = jnp.sum(s * s)
        d = 1.0 - (2.0 * intersect + smooth) / (z + y + smooth)
        loss = loss + d * weight[i]
    return loss / C


if __name__ == "__main__":
    n_classes = 4
    N, H, W = 2, 16, 16

    key = jax.random.PRNGKey(0)
    k_in, k_tgt, k_in2, k_tgt2 = jax.random.split(key, 4)
    inputs = jax.random.normal(k_in, (N, n_classes, H, W), dtype=jnp.float32)
    target = jax.random.randint(k_tgt, (N, H, W), 0, n_classes, dtype=jnp.int32)

    # 1) fused in-kernel softmax, single tile
    out = jax.block_until_ready(dice_loss(inputs, target, weight=None, softmax=True))
    ref = _dice_loss_ref(inputs, target, weight=None, softmax=True)
    assert jnp.allclose(out, ref, rtol=1e-4, atol=1e-6), (out, ref)

    # 2) raw-score path, class weights, multi-tile accumulation
    w = [1.0, 2.0, 0.5, 1.0]
    out2 = jax.block_until_ready(
        dice_loss(inputs, target, weight=w, softmax=False, tile_lanes=128))
    ref2 = _dice_loss_ref(inputs, target, weight=w, softmax=False)
    assert jnp.allclose(out2, ref2, rtol=1e-4, atol=1e-6), (out2, ref2)

    # 3) ragged spatial size (exercises lane padding + valid-mask under softmax)
    H3, W3 = 10, 13
    inputs3 = jax.random.normal(k_in2, (N, n_classes, H3, W3), dtype=jnp.float32)
    target3 = jax.random.randint(k_tgt2, (N, H3, W3), 0, n_classes, dtype=jnp.int32)
    out3 = jax.block_until_ready(
        dice_loss(inputs3, target3, weight=None, softmax=True, tile_lanes=128))
    ref3 = _dice_loss_ref(inputs3, target3, weight=None, softmax=True)
    assert jnp.allclose(out3, ref3, rtol=1e-4, atol=1e-6), (out3, ref3)

    print("KERNEL_OK")
</pallas_src>

<mosaic_0001>
module attributes {stable_mosaic.version = 11 : i64} {
  func.func @_dice_sums_kernel(%arg0: i32, %arg1: i32, %arg2: memref<1x4x256xf32, #tpu.memory_space<vmem>>, %arg3: memref<1x1x256xi32, #tpu.memory_space<vmem>>, %arg4: memref<1x4x1xf32, #tpu.memory_space<vmem>>, %arg5: memref<1x4x1xf32, #tpu.memory_space<vmem>>, %arg6: memref<1x4x1xf32, #tpu.memory_space<vmem>>, %arg7: memref<4x1xf32, #tpu.memory_space<vmem>>, %arg8: memref<4x1xf32, #tpu.memory_space<vmem>>, %arg9: memref<4x1xf32, #tpu.memory_space<vmem>>) attributes {dimension_semantics = [#tpu.dimension_semantics<parallel>, #tpu.dimension_semantics<arbitrary>], iteration_bounds = array<i64: 2, 1>, scalar_prefetch = 0 : i64, scratch_operands = 3 : i64, tpu.core_type = #tpu.core_type<tc>, window_params = [{transform_indices = @transform_0, window_bounds = array<i64: 1, 4, 256>}, {transform_indices = @transform_1, window_bounds = array<i64: 1, 1, 256>}, {transform_indices = @transform_2, window_bounds = array<i64: 1, 4, 1>}, {transform_indices = @transform_3, window_bounds = array<i64: 1, 4, 1>}, {transform_indices = @transform_4, window_bounds = array<i64: 1, 4, 1>}]} {
    %c0_i32 = arith.constant 0 : i32
    %0 = arith.cmpi eq, %arg1, %c0_i32 : i32
    %1 = arith.extui %0 : i1 to i32
    %c0_i32_0 = arith.constant 0 : i32
    %2 = arith.cmpi ne, %1, %c0_i32_0 : i32
    scf.if %2 {
      %cst_26 = arith.constant 0.000000e+00 : f32
      %47 = vector.broadcast %cst_26 : f32 to vector<4x1xf32>
      %c0_27 = arith.constant 0 : index
      %c0_28 = arith.constant 0 : index
      %48 = vector.load %arg7[%c0_27, %c0_28] : memref<4x1xf32, #tpu.memory_space<vmem>>, vector<4x1xf32>
      tpu.vector_store %arg7[%c0_27, %c0_28], %47 {strides = array<i32>} : memref<4x1xf32, #tpu.memory_space<vmem>>, vector<4x1xf32>,
      %cst_29 = arith.constant 0.000000e+00 : f32
      %49 = vector.broadcast %cst_29 : f32 to vector<4x1xf32>
      %c0_30 = arith.constant 0 : index
      %c0_31 = arith.constant 0 : index
      %50 = vector.load %arg8[%c0_30, %c0_31] : memref<4x1xf32, #tpu.memory_space<vmem>>, vector<4x1xf32>
      tpu.vector_store %arg8[%c0_30, %c0_31], %49 {strides = array<i32>} : memref<4x1xf32, #tpu.memory_space<vmem>>, vector<4x1xf32>,
      %cst_32 = arith.constant 0.000000e+00 : f32
      %51 = vector.broadcast %cst_32 : f32 to vector<4x1xf32>
      %c0_33 = arith.constant 0 : index
      %c0_34 = arith.constant 0 : index
      %52 = vector.load %arg9[%c0_33, %c0_34] : memref<4x1xf32, #tpu.memory_space<vmem>>, vector<4x1xf32>
      tpu.vector_store %arg9[%c0_33, %c0_34], %51 {strides = array<i32>} : memref<4x1xf32, #tpu.memory_space<vmem>>, vector<4x1xf32>,
    } else {
    }
    %c0 = arith.constant 0 : index
    %c0_1 = arith.constant 0 : index
    %c0_2 = arith.constant 0 : index
    %3 = vector.load %arg2[%c0, %c0_1, %c0_2] : memref<1x4x256xf32, #tpu.memory_space<vmem>>, vector<1x4x256xf32>
    %4 = vector.shape_cast %3 : vector<1x4x256xf32> to vector<4x256xf32>
    %c0_3 = arith.constant 0 : index
    %c0_4 = arith.constant 0 : index
    %c0_5 = arith.constant 0 : index
    %5 = vector.load %arg3[%c0_3, %c0_4, %c0_5] : memref<1x1x256xi32, #tpu.memory_space<vmem>>, vector<1x1x256xi32>
    %6 = vector.shape_cast %5 : vector<1x1x256xi32> to vector<1x256xi32>
    %cst = arith.constant dense<0xFF800000> : vector<256xf32>
    %7 = vector.multi_reduction <maximumf>, %4, %cst [0] : vector<4x256xf32> to vector<256xf32>
    %8 = vector.shape_cast %7 : vector<256xf32> to vector<1x256xf32>
    %9 = vector.broadcast %8 : vector<1x256xf32> to vector<4x256xf32>
    %10 = arith.subf %4, %9 : vector<4x256xf32>
    %11 = math.exp %10 : vector<4x256xf32>
    %cst_6 = arith.constant dense<0.000000e+00> : vector<256xf32>
    %12 = vector.multi_reduction <add>, %11, %cst_6 [0] : vector<4x256xf32> to vector<256xf32>
    %13 = vector.shape_cast %12 : vector<256xf32> to vector<1x256xf32>
    %14 = vector.broadcast %13 : vector<1x256xf32> to vector<4x256xf32>
    %15 = arith.divf %11, %14 : vector<4x256xf32>
    %c0_i32_7 = arith.constant 0 : i32
    %16 = vector.broadcast %c0_i32_7 : i32 to vector<1x256xi32>
    %17 = arith.cmpi sge, %6, %16 : vector<1x256xi32>
    %cst_8 = arith.constant 0.000000e+00 : f32
    %18 = vector.shape_cast %17 : vector<1x256xi1> to vector<1x256xi1>
    %19 = vector.broadcast %18 : vector<1x256xi1> to vector<4x256xi1>
    %20 = vector.broadcast %cst_8 : f32 to vector<4x256xf32>
    %21 = arith.select %19, %15, %20 : vector<4x256xi1>, vector<4x256xf32>
    %22 = tpu.iota {dimensions = array<i32: 0>} : vector<4x256xi32>
    %23 = vector.broadcast %6 : vector<1x256xi32> to vector<4x256xi32>
    %24 = arith.cmpi eq, %23, %22 : vector<4x256xi32>
    %25 = arith.extui %24 : vector<4x256xi1> to vector<4x256xi32>
    %26 = arith.sitofp %25 : vector<4x256xi32> to vector<4x256xf32>
    %c0_9 = arith.constant 0 : index
    %c0_10 = arith.constant 0 : index
    %27 = vector.load %arg7[%c0_9, %c0_10] : memref<4x1xf32, #tpu.memory_space<vmem>>, vector<4x1xf32>
    %28 = arith.mulf %21, %26 : vector<4x256xf32>
    %cst_11 = arith.constant dense<0.000000e+00> : vector<4xf32>
    %29 = vector.multi_reduction <add>, %28, %cst_11 [1] : vector<4x256xf32> to vector<4xf32>
    %30 = vector.shape_cast %29 : vector<4xf32> to vector<4x1xf32>
    %31 = arith.addf %27, %30 : vector<4x1xf32>
    %c0_12 = arith.constant 0 : index
    %c0_13 = arith.constant 0 : index
    %32 = vector.load %arg7[%c0_12, %c0_13] : memref<4x1xf32, #tpu.memory_space<vmem>>, vector<4x1xf32>
    tpu.vector_store %arg7[%c0_12, %c0_13], %31 {strides = array<i32>} : memref<4x1xf32, #tpu.memory_space<vmem>>, vector<4x1xf32>,
    %c0_14 = arith.constant 0 : index
    %c0_15 = arith.constant 0 : index
    %33 = vector.load %arg8[%c0_14, %c0_15] : memref<4x1xf32, #tpu.memory_space<vmem>>, vector<4x1xf32>
    %34 = arith.mulf %21, %21 : vector<4x256xf32>
    %cst_16 = arith.constant dense<0.000000e+00> : vector<4xf32>
    %35 = vector.multi_reduction <add>, %34, %cst_16 [1] : vector<4x256xf32> to vector<4xf32>
    %36 = vector.shape_cast %35 : vector<4xf32> to vector<4x1xf32>
    %37 = arith.addf %33, %36 : vector<4x1xf32>
    %c0_17 = arith.constant 0 : index
    %c0_18 = arith.constant 0 : index
    %38 = vector.load %arg8[%c0_17, %c0_18] : memref<4x1xf32, #tpu.memory_space<vmem>>, vector<4x1xf32>
    tpu.vector_store %arg8[%c0_17, %c0_18], %37 {strides = array<i32>} : memref<4x1xf32, #tpu.memory_space<vmem>>, vector<4x1xf32>,
    %c0_19 = arith.constant 0 : index
    %c0_20 = arith.constant 0 : index
    %39 = vector.load %arg9[%c0_19, %c0_20] : memref<4x1xf32, #tpu.memory_space<vmem>>, vector<4x1xf32>
    %cst_21 = arith.constant dense<0.000000e+00> : vector<4xf32>
    %40 = vector.multi_reduction <add>, %26, %cst_21 [1] : vector<4x256xf32> to vector<4xf32>
    %41 = vector.shape_cast %40 : vector<4xf32> to vector<4x1xf32>
    %42 = arith.addf %39, %41 : vector<4x1xf32>
    %c0_22 = arith.constant 0 : index
    %c0_23 = arith.constant 0 : index
    %43 = vector.load %arg9[%c0_22, %c0_23] : memref<4x1xf32, #tpu.memory_space<vmem>>, vector<4x1xf32>
    tpu.vector_store %arg9[%c0_22, %c0_23], %42 {strides = array<i32>} : memref<4x1xf32, #tpu.memory_space<vmem>>, vector<4x1xf32>,
    %c0_i32_24 = arith.constant 0 : i32
    %44 = arith.cmpi eq, %arg1, %c0_i32_24 : i32
    %45 = arith.extui %44 : i1 to i32
    %c0_i32_25 = arith.constant 0 : i32
    %46 = arith.cmpi ne, %45, %c0_i32_25 : i32
    scf.if %46 {
      %c0_26 = arith.constant 0 : index
      %c0_27 = arith.constant 0 : index
      %47 = vector.load %arg7[%c0_26, %c0_27] : memref<4x1xf32, #tpu.memory_space<vmem>>, vector<4x1xf32>
      %c0_28 = arith.constant 0 : index
      %c0_29 = arith.constant 0 : index
      %c0_30 = arith.constant 0 : index
      %48 = vector.load %arg4[%c0_28, %c0_29, %c0_30] : memref<1x4x1xf32, #tpu.memory_space<vmem>>, vector<1x4x1xf32>
      %49 = vector.shape_cast %48 : vector<1x4x1xf32> to vector<4x1xf32>
      %50 = vector.shape_cast %47 : vector<4x1xf32> to vector<1x4x1xf32>
      tpu.vector_store %arg4[%c0_28, %c0_29, %c0_30], %50 {strides = array<i32>} : memref<1x4x1xf32, #tpu.memory_space<vmem>>, vector<1x4x1xf32>,
      %c0_31 = arith.constant 0 : index
      %c0_32 = arith.constant 0 : index
      %51 = vector.load %arg8[%c0_31, %c0_32] : memref<4x1xf32, #tpu.memory_space<vmem>>, vector<4x1xf32>
      %c0_33 = arith.constant 0 : index
      %c0_34 = arith.constant 0 : index
      %c0_35 = arith.constant 0 : index
      %52 = vector.load %arg5[%c0_33, %c0_34, %c0_35] : memref<1x4x1xf32, #tpu.memory_space<vmem>>, vector<1x4x1xf32>
      %53 = vector.shape_cast %52 : vector<1x4x1xf32> to vector<4x1xf32>
      %54 = vector.shape_cast %51 : vector<4x1xf32> to vector<1x4x1xf32>
      tpu.vector_store %arg5[%c0_33, %c0_34, %c0_35], %54 {strides = array<i32>} : memref<1x4x1xf32, #tpu.memory_space<vmem>>, vector<1x4x1xf32>,
      %c0_36 = arith.constant 0 : index
      %c0_37 = arith.constant 0 : index
      %55 = vector.load %arg9[%c0_36, %c0_37] : memref<4x1xf32, #tpu.memory_space<vmem>>, vector<4x1xf32>
      %c0_38 = arith.constant 0 : index
      %c0_39 = arith.constant 0 : index
      %c0_40 = arith.constant 0 : index
      %56 = vector.load %arg6[%c0_38, %c0_39, %c0_40] : memref<1x4x1xf32, #tpu.memory_space<vmem>>, vector<1x4x1xf32>
      %57 = vector.shape_cast %56 : vector<1x4x1xf32> to vector<4x1xf32>
      %58 = vector.shape_cast %55 : vector<4x1xf32> to vector<1x4x1xf32>
      tpu.vector_store %arg6[%c0_38, %c0_39, %c0_40], %58 {strides = array<i32>} : memref<1x4x1xf32, #tpu.memory_space<vmem>>, vector<1x4x1xf32>,
    } else {
    }
    return
  }
  func.func @transform_0(%arg0: i32, %arg1: i32) -> (i32, i32, i32) {
    %c0_i32 = arith.constant 0 : i32
    %c0_i32_0 = arith.constant 0 : i32
    return %arg0, %c0_i32, %arg1 : i32, i32, i32
  }
  func.func @transform_1(%arg0: i32, %arg1: i32) -> (i32, i32, i32) {
    %c0_i32 = arith.constant 0 : i32
    %c0_i32_0 = arith.constant 0 : i32
    return %arg0, %c0_i32, %arg1 : i32, i32, i32
  }
  func.func @transform_2(%arg0: i32, %arg1: i32) -> (i32, i32, i32) {
    %c0_i32 = arith.constant 0 : i32
    %c0_i32_0 = arith.constant 0 : i32
    %c0_i32_1 = arith.constant 0 : i32
    return %arg0, %c0_i32, %c0_i32_0 : i32, i32, i32
  }
  func.func @transform_3(%arg0: i32, %arg1: i32) -> (i32, i32, i32) {
    %c0_i32 = arith.constant 0 : i32
    %c0_i32_0 = arith.constant 0 : i32
    %c0_i32_1 = arith.constant 0 : i32
    return %arg0, %c0_i32, %c0_i32_0 : i32, i32, i32
  }
  func.func @transform_4(%arg0: i32, %arg1: i32) -> (i32, i32, i32) {
    %c0_i32 = arith.constant 0 : i32
    %c0_i32_0 = arith.constant 0 : i32
    %c0_i32_1 = arith.constant 0 : i32
    return %arg0, %c0_i32, %c0_i32_0 : i32, i32, i32
  }
}

</mosaic_0001>

<bundles_post_ra>
// kernel: tpu_custom_call.1
= control target key start
LH: loop header
LB: loop body
LE: loop exit
PB: predicated region body
PF: predicated region fallthrough
CT: control target
= control target key end

     0   :  { %10 = vsyncpa [#allocation6], 0  ;;  %s1013_s0 = inlined_call_operand.hbm [shape: f32[2,4,256], index: 0, kind: input, shape index: {}]   ;;  %s1014_s1 = inlined_call_operand.hbm [shape: s32[2,1,256], index: 1, kind: input, shape index: {}]   ;;  %s1015_s2 = inlined_call_operand.vmem [shape: f32[2,4,1], index: 2, kind: output, shape index: {0}]   ;;  %s1016_s3 = inlined_call_operand.vmem [shape: f32[2,4,1], index: 3, kind: output, shape index: {1}]   ;;  %s1017_s4 = inlined_call_operand.vmem [shape: f32[2,4,1], index: 4, kind: output, shape index: {2}]  }
   0x1   :  { %12 = vsyncpa [#allocation6 + $0x1], 0 }
   0x2   :  { %13 = vsyncpa [#allocation8], 0 }
   0x3   :  { %15 = vsyncpa [#allocation8 + $0x1], 0  ;;  %s822_s15 = smov 0   ;;  %s824_s16 = smov 0  }
   0x4   :  { %s826_s17 = smov 0   ;;  %s828_s18 = smov 0  }
   0x5   :  { %s830_s19 = smov 0   ;;  %s832_s20 = smov 0  }
   0x6 LB: > { %s588_s21 = sadd.s32 4294967295, %s791_s20   ;;  %s33_s22 = sadd.s32 1, %s787_s19  ;;  %s791_s20 = sphi %s832_s20, %s21_s20   ;;  %s787_s19 = sphi %s830_s19, %s1031_s19   ;;  %s783_s18 = sphi %s828_s18, %s1030_s18   ;;  %s779_s17 = sphi %s826_s17, %s1029_s17   ;;  %s775_s16 = sphi %s824_s16, %s1028_s16   ;;  %s771_s15 = sphi %s822_s15, %s1027_s15  }
   0x7   : > { %p35_p0 = scmp.ge.s32.totalorder %s33_s22, 2  ;;  %s42_s23 = sadd.s32 1, %s779_s17 }
   0x8   : > { %p49_p1 = scmp.ne.s32.totalorder %s779_s17, %s775_s16  ;;  %p50_p2 = scmp.eq.s32.totalorder %s791_s20, 0 }
   0x9   : > { %s1033_s22 = smov (%p35_p0, %s33_s22), 0  ;;  %p55_p4 = scmp.ne.s32.totalorder %s775_s16, %s771_s15 }
   0xa   : > { %p858_p3 = por %p50_p2, %p49_p1  ;;  %s37_s25 = ssub.s32 %s787_s19, %s1033_s22 }
   0xb   : > { %p56_p5 = scmp.eq.s32.totalorder %s588_s21, 0  ;;  %p40_p6 = scmp.eq.s32.totalorder %s37_s25, 0 }
   0xc   : > { %p621_p8 = scmp.lt.s32.totalorder %s791_s20, 2  ;;  %s874_s28 = sand.u32 1, %s779_s17  }
   0xd   : > { %p865_p7 = por %p56_p5, %p55_p4  ;;  %s608_s29 = sshll.u32 %s787_s19, 7 }
   0xe   : > { %s871_s27 = scalar_select %p40_p6, %s779_s17, %s42_s23  }
   0xf   : > { %s1020_s26 = scalar_select %p865_p7, 1, 0 }
  0x10   : > { %s592_s30 = sshll.u32 %s874_s28, 3  ;;  %s881_s7 = scalar_lea.hbm %s1013_s0, %s608_s29 }
  0x11   : > { %s189_s8 = scalar_lea.vmem [#allocation5], %s592_s30  ;;  %p885_p9 = pnand %p621_p8, %p858_p3 }
  0x12   : > { %s199_s9 = sshll.u32 %s189_s8, 4  ;;  %s186_s11 = scalar_lea.sflag [#allocation6], %s874_s28  ;;  %s889_s9 = int_to_ptr.vmem [resolvable:$true] %s199_s9 }
  0x13   : > { %s677_s12 = scalar_lea.hbm %s881_s7, 128  ;;  %p679_p13 = pneg %p885_p9 }
  0x14   : > { %p678_p12 = scmp.ne.s32.totalorder %s881_s7, %s677_s12  ;;  %s682_s15 = scalar_lea.hbm %s1013_s0, 256 }
  0x15   : > { %p683_p2 = scmp.lt.u32.totalorder %s881_s7, %s1013_s0  ;;  %p684_p3 = scmp.lt.u32.totalorder %s682_s15, %s677_s12 }
  0x16   : > { %p680_p0 = pnand %p679_p13, %p678_p12  ;;  %p686_p5 = scmp.lt.u32.totalorder %s677_s12, %s881_s7 }
  0x17   : > { %p685_p4 = por %p684_p3, %p683_p2 }
  0x18   : > { %p681_p1 = pneg %p680_p0 }
  0x19   : > { %p687_p6 = por %p686_p5, %p685_p4 }
  0x1b   : > { %p688_p8 = pnand %p687_p6, %p681_p1 }
  0x1d   : > { %691 = shalt.err (!%p688_p8)
}
  0x1e   : > { %s692_s24 = scalar_lea.vmem %s889_s9, 128  ;;  %s793_s25 = smov [#allocation5]  }
  0x1f   : > { %p693_p12 = scmp.ne.s32.totalorder %s889_s9, %s692_s24  ;;  %s697_s29 = sshll.u32 %s793_s25, 4  ;;  %s698_s29 = int_to_ptr.vmem [resolvable:$false] %s697_s29 }
  0x20   : > { %s699_s30 = scalar_lea.vmem %s698_s29, 256  ;;  %p700_p11 = scmp.lt.s32.totalorder %s889_s9, %s698_s29 }
  0x21   : > { %p695_p0 = pnand %p693_p12, %p679_p13  ;;  %p701_p2 = scmp.lt.s32.totalorder %s699_s30, %s692_s24 }
  0x23   : > { %p696_p10 = pneg %p695_p0  ;;  %p702_p3 = por %p701_p2, %p700_p11 }
  0x25   : > { %p703_p4 = pnand %p702_p3, %p696_p10 }
  0x27   : > { %706 = shalt.err (!%p703_p4)
}
  0x28   : > { %617 = dma.hbm_to_vmem [thread:$0]  (!%p885_p9), %s881_s7, 128, %s889_s9, %s186_s11  }
  0x29   : > { %p1022_p1 = scmp.lt.s32.totalorder %s791_s20, 3  ;;  %p1023_p5 = scmp.ge.s32.totalorder %s791_s20, 1 }
  0x2a   : > { %s595_s6 = sshll.u32 %s874_s28, 1  ;;  %s609_s8 = sshll.u32 %s787_s19, 5 }
  0x2b   : > { %p923_p6 = pnand %p1023_p5, %p1022_p1  ;;  %s932_s14 = scalar_lea.hbm %s1014_s1, %s609_s8 }
  0x2c   : > { %s210_s15 = scalar_lea.vmem [#allocation7], %s595_s6  ;;  %s207_s7 = scalar_lea.sflag [#allocation8], %s874_s28 }
  0x2d   : > { %s1024_s5 = scalar_select %p923_p6, 1, 0 }
  0x2e   : > { %s220_s21 = sshll.u32 %s210_s15, 4  ;;  %s707_s9 = scalar_lea.hbm %s932_s14, 32  ;;  %s221_s21 = int_to_ptr.vmem [resolvable:$true] %s220_s21 }
  0x2f   : > { %p708_p10 = scmp.ne.s32.totalorder %s932_s14, %s707_s9  ;;  %s712_s24 = scalar_lea.hbm %s1014_s1, 64 }
  0x30   : > { %p713_p12 = scmp.lt.u32.totalorder %s932_s14, %s1014_s1  ;;  %p714_p0 = scmp.lt.u32.totalorder %s712_s24, %s707_s9 }
  0x31   : > { %p710_p11 = pnand %p708_p10, %p679_p13  ;;  %p716_p3 = scmp.lt.u32.totalorder %s707_s9, %s932_s14 }
  0x32   : > { %p715_p2 = por %p714_p0, %p713_p12 }
  0x33   : > { %p711_p8 = pneg %p710_p11 }
  0x34   : > { %p717_p4 = por %p716_p3, %p715_p2 }
  0x36   : > { %p718_p1 = pnand %p717_p4, %p711_p8 }
  0x38   : > { %721 = shalt.err (!%p718_p1)
}
  0x39   : > { %s722_s28 = scalar_lea.vmem %s221_s21, 32  ;;  %s794_s30 = smov [#allocation7]  }
  0x3a   : > { %p723_p5 = scmp.ne.s32.totalorder %s221_s21, %s722_s28  ;;  %s727_s6 = sshll.u32 %s794_s30, 4  ;;  %s728_s6 = int_to_ptr.vmem [resolvable:$false] %s727_s6 }
  0x3b   : > { %s729_s8 = scalar_lea.vmem %s728_s6, 64  ;;  %p730_p7 = scmp.lt.s32.totalorder %s221_s21, %s728_s6 }
  0x3c   : > { %p725_p10 = pnand %p723_p5, %p679_p13  ;;  %p731_p6 = scmp.lt.s32.totalorder %s729_s8, %s722_s28 }
  0x3e   : > { %p726_p11 = pneg %p725_p10  ;;  %p732_p0 = por %p731_p6, %p730_p7 }
  0x40   : > { %p733_p12 = pnand %p732_p0, %p726_p11 }
  0x42   : > { %736 = shalt.err (!%p733_p12)
}
  0x43   : > { %620 = dma.hbm_to_vmem [thread:$0]  (!%p885_p9), %s932_s14, 32, %s221_s21, %s207_s7  }
  0x44   : > { %p1025_p8 = scmp.ne.s32.totalorder %s1024_s5, 0 }
  0x45   : > { %s231_s12 = sand.u32 (!%p1025_p8), 1, %s775_s16   ;;  %p1026_p13 = scmp.ne.s32.totalorder (!%p1025_p8), %s1020_s26, 0 }
  0x46   : > { %229 = sbr.rel (%p1025_p8) target bundleno = 309 (0x135), region = 28  ;;  %s599_s13 = sshll.u32 (!%p1025_p8), %s231_s12, 3 }
  0x47   : > { %s232_s15 = scalar_lea.sflag (!%p1025_p8), [#allocation6], %s231_s12  ;;  %s235_s9 = scalar_lea.vmem (!%p1025_p8), [#allocation5], %s599_s13 }
  0x4d   : > { %762 = dma.done.wait (%p1026_p13), %s232_s15, 128  }
  0x4e   : > { %764 = vsyncadd (%p1026_p13), %s232_s15, 4294967168  ;;  %s600_s11 = sshll.u32 %s231_s12, 1  ;;  %s241_s23 = scalar_lea.sflag [#allocation8], %s231_s12 }
  0x4f   : > { %s244_s10 = scalar_lea.vmem [#allocation7], %s600_s11 }
  0x50   : > { %766 = dma.done.wait (%p1026_p13), %s241_s23, 32  }
  0x51   : > { %768 = vsyncadd (%p1026_p13), %s241_s23, 4294967264  ;;  %v355_v0 = vlaneseq  ;;  %vm299_vm0 = vcmask 3072   ;;  %v795_v2 = vmov 0.0   ;;  %vm308_vm1 = vcmask 1043456   ;;  %v303_v5 = vld [vmem:[%s235_s9] sm:$0xff]  ;;  %p283_p7 = scmp.lt.s32.totalorder %s783_s18, 1 }
  0x52   : > { %300 = vst.msk [vmem:[#allocation2] sm:$0xf] %vm299_vm0, %v795_v2  ;;  %301 = vst.msk [vmem:[#allocation3] sm:$0xf] %vm299_vm0, %v795_v2  ;;  %v304_v6 = vld [vmem:[%s244_s10] sm:$0x3]  ;;  %v306_v7 = vcombine.high %v303_v5, %v303_v5 }
  0x53   : > { %v356_v1 = vshrl.u32 %v355_v0, 7  ;;  %302 = vst.msk [vmem:[#allocation4] sm:$0xf] %vm299_vm0, %v795_v2  ;;  %v309_v8 = vsel %vm308_vm1, %v303_v5, -inf  ;;  %vm353_vm4 = vcmp.ge.s32.totalorder %v304_v6, 0  ;;  %v796_v49 = vmov 0  }
  0x54   : > { %v310_v10 = vrot.slane %v309_v8, 4  ;;  %v316_v12 = vsel %vm308_vm1, %v306_v7, -inf  ;;  %v354_v50 = vsel %vm353_vm4, 1, %v796_v49  ;;  %s1035_s18 = smov (!%p283_p7, %s783_s18), 1 }
  0x55   : > { %v357_v3 = vsub.s32 0, %v356_v1  ;;  %v361_v4 = vsub.s32 1, %v356_v1  ;;  %v317_v14 = vrot.slane %v316_v12, 4  ;;  %s601_s26 = sshll.u32 %s1035_s18, 2 }
  0x56   : > { %v311_v13 = vmax.f32 %v309_v8, %v310_v10  ;;  %s294_s21 = scalar_lea.vmem %s1017_s4, %s601_s26  ;;  %s286_s18 = scalar_lea.vmem %s1015_s2, %s601_s26 }
  0x57   : > { %v375_v9 = vrot.slane %v304_v6, %v357_v3  ;;  %v379_v11 = vrot.slane %v304_v6, %v361_v4  ;;  %v318_v19 = vmax.f32 %v316_v12, %v317_v14  ;;  %v358_v51 = vrot.slane %v354_v50, %v357_v3  ;;  %s290_s28 = scalar_lea.vmem %s1016_s3, %s601_s26 }
  0x58   : > { %v312_v18 = vrot.slane %v311_v13, 2  ;;  %v362_v52 = vrot.slane %v354_v50, %v361_v4 }
  0x59   : > { %vm380_vm2 = vcmp.eq.s32.totalorder %v375_v9, %v356_v1  ;;  %vm381_vm3 = vcmp.eq.s32.totalorder %v379_v11, %v356_v1  ;;  %v319_v23 = vrot.slane %v318_v19, 2  ;;  %vm363_vm5 = vcmp.eq.s32.totalorder %v358_v51, 1  ;;  %v386_v8 = vld [vmem:[#allocation2] sm:$0xf]  ;;  %v397_v11 = vld [vmem:[#allocation3] sm:$0xf] }
  0x5a   : > { %v604_v15 = vsel %vm380_vm2, 1.0, %v795_v2  ;;  %v605_v16 = vsel %vm381_vm3, 1.0, %v795_v2  ;;  %v313_v22 = vmax.f32 %v311_v13, %v312_v18  ;;  %vm364_vm6 = vcmp.eq.s32.totalorder %v362_v52, 1  ;;  %v407_v4 = vld [vmem:[#allocation4] sm:$0xf] }
  0x5b   : > { %v408_v17 = vsel %vm308_vm1, %v604_v15, 0.0  ;;  %v409_v20 = vsel %vm308_vm1, %v605_v16, 0.0  ;;  %v320_v25 = vmax.f32 %v318_v19, %v319_v23 }
  0x5c   : > { %v410_v21 = vadd.f32 %v409_v20, %v408_v17  ;;  %v314_v24 = vrot.slane %v313_v22, 1 }
  0x5d   : > { %v321_v27 = vrot.slane %v320_v25, 1 }
  0x5e   : > { %411 = vadd.xlane.f32.xlu1 %v410_v21  ;;  %v315_v26 = vmax.f32 %v313_v22, %v314_v24 }
  0x5f   : > { %v322_v28 = vmax.f32 %v320_v25, %v321_v27 }
  0x61   : > { %v325_v29 = vcombine.low %v315_v26, %v322_v28 }
  0x63   : > { %v327_v30 = vsub.f32 %v303_v5, %v325_v29 }
  0x65   : > { %v328_v31 = vmul.f32 1.442695, %v327_v30 }
  0x67   : > { %673 = vpow2.f32 %v328_v31 }
  0x71   : > { %v674_v32 = vpop.eup %673 }
  0x72   : > { %v331_v33 = vcombine.high %v674_v32, %v674_v32  ;;  %v333_v34 = vsel %vm308_vm1, %v674_v32, 0.0 }
  0x73   : > { %v334_v35 = vrot.slane %v333_v34, 4 }
  0x74   : > { %v340_v36 = vsel %vm308_vm1, %v331_v33, 0.0 }
  0x75   : > { %v335_v37 = vadd.f32 %v334_v35, %v333_v34  ;;  %v341_v38 = vrot.slane %v340_v36, 4 }
  0x77   : > { %v336_v39 = vrot.slane %v335_v37, 2  ;;  %v342_v40 = vadd.f32 %v341_v38, %v340_v36 }
  0x79   : > { %v337_v41 = vadd.f32 %v336_v39, %v335_v37  ;;  %v343_v42 = vrot.slane %v342_v40, 2 }
  0x7b   : > { %v338_v43 = vrot.slane %v337_v41, 1  ;;  %v344_v44 = vadd.f32 %v343_v42, %v342_v40 }
  0x7d   : > { %v339_v45 = vadd.f32 %v338_v43, %v337_v41  ;;  %v345_v46 = vrot.slane %v344_v44, 1 }
  0x7f   : > { %v346_v47 = vadd.f32 %v345_v46, %v344_v44 }
  0x81   : > { %v349_v48 = vcombine.low %v339_v45, %v346_v47 }
  0x83   : > { %675 = vrcp.f32 %v349_v48 }
  0x8d   : > { %v676_v53 = vpop.eup %675 }
  0x8e   : > { %v352_v54 = vmul.f32 %v676_v53, %v674_v32 }
  0x90   : > { %v366_v55 = vcombine.high %v352_v54, %v352_v54  ;;  %v368_v56 = vsel %vm363_vm5, %v352_v54, 0.0 }
  0x91   : > { %v387_v57 = vmul.f32 %v604_v15, %v368_v56  ;;  %v398_v58 = vmul.f32 %v368_v56, %v368_v56 }
  0x92   : > { %v369_v59 = vsel %vm364_vm6, %v366_v55, 0.0 }
  0x93   : > { %v388_v60 = vmul.f32 %v605_v16, %v369_v59  ;;  %v389_v61 = vsel %vm308_vm1, %v387_v57, 0.0  ;;  %v399_v62 = vmul.f32 %v369_v59, %v369_v59  ;;  %v400_v0 = vsel %vm308_vm1, %v398_v58, 0.0 }
  0x95   : > { %v390_v63 = vsel %vm308_vm1, %v388_v60, 0.0  ;;  %v401_v1 = vsel %vm308_vm1, %v399_v62, 0.0 }
  0x96   : > { %v391_v2 = vadd.f32 %v390_v63, %v389_v61  ;;  %v402_v3 = vadd.f32 %v401_v1, %v400_v0 }
  0x98   : > { %392 = vadd.xlane.f32.xlu0 %v391_v2 }
  0x9c   : > { %403 = vadd.xlane.f32.xlu0 %v402_v3 }
  0xeb   : > { %v412_v5 = vpop.xlane.xlu1 %411 }
  0xec   : > { %v413_v6 = vadd.f32 %v412_v5, %v407_v4 }
  0xee   : > { %414 = vst.msk [vmem:[#allocation4] sm:$0xf] %vm299_vm0, %v413_v6 }
  0xf5   : > { %v422_v7 = vld [vmem:[#allocation4] sm:$0xf] }
  0xf6   : > { %423 = vst.msk [vmem:[%s294_s21] sm:$0xf] %vm299_vm0, %v422_v7 }
 0x125   : > { %v393_v9 = vpop.xlane.xlu0 %392 }
 0x126   : > { %v394_v10 = vadd.f32 %v393_v9, %v386_v8 }
 0x128   : > { %396 = vst.msk [vmem:[#allocation2] sm:$0xf] %vm299_vm0, %v394_v10 }
 0x129   : > { %v404_v12 = vpop.xlane.xlu0 %403 }
 0x12a   : > { %v405_v13 = vadd.f32 %v404_v12, %v397_v11 }
 0x12c   : > { %406 = vst.msk [vmem:[#allocation3] sm:$0xf] %vm299_vm0, %v405_v13 }
 0x12f   : > { %v418_v14 = vld [vmem:[#allocation2] sm:$0xf] }
 0x130   : > { %419 = vst.msk [vmem:[%s286_s18] sm:$0xf] %vm299_vm0, %v418_v14 }
 0x133   : > { %v420_v15 = vld [vmem:[#allocation3] sm:$0xf] }
 0x134   : > { %421 = vst.msk [vmem:[%s290_s28] sm:$0xf] %vm299_vm0, %v420_v15 }
 0x135 PF: > { %s21_s20 = sadd.s32 1, %s791_s20   ;;  %s1027_s15 = smov %s775_s16 }
 0x136   : > { %p18_p9 = scmp.ge.s32.totalorder %s21_s20, 4   ;;  %s1028_s16 = smov %s779_s17 }
 0x137   : > { %s1029_s17 = smov %s871_s27  ;;  %s1030_s18 = smov %s787_s19 }
 0x138   : > { %s1031_s19 = smov %s1033_s22  ;;  %20 = sbr.rel (!%p18_p9) target bundleno = 6 (0x6), region = 113 }
 0x13f   :  { %471 = vsyncpa [#allocation6], 1 }
 0x140   :  { %473 = vsyncpa [#allocation6 + $0x1], 1 }
 0x141   :  { %474 = vsyncpa [#allocation8], 1 }
 0x142   :  { %476 = vsyncpa [#allocation8 + $0x1], 1 }

</bundles_post_ra>
